<compile_context>
chip_gen: v7x
topology: tpu7x:2x2x1
jax: 0.10.0
libtpu: 0.0.40
codegen_flags: <defaults>
</compile_context>

<pallas_src>
import jax
import jax.numpy as jnp
from jax import lax
from jax.experimental import pallas as pl
from jax.experimental.pallas import tpu as pltpu


def _largest_divisor_at_most(n, target):
    t = max(1, min(int(target), int(n)))
    while n % t:
        t -= 1
    return t


# ----------------------------------------------------------------------------
# Kernel 1: ConvTranspose2d(kernel_size=2, stride=2)
# Per input pixel this is a matmul x[n,i,j,:] @ W(Cin, 2*2*Cout).  We split the
# weight by kh so the kernel writes an output block shaped (rows, 2, W, 2*Cout);
# the (kh, kw) interleave then becomes a free reshape in the wrapper.
# ----------------------------------------------------------------------------
def _deconv2x2_kernel(x_ref, w_ref, b_ref, o_ref):
    # x_ref: (tr, W, Cin); w_ref: (2, Cin, 2*Cout); b_ref: (1, 2*Cout)
    # o_ref: (tr, 2, W, 2*Cout)   (dims: row, kh, col, (kw, co))
    tr, W, Cin = x_ref.shape
    x = x_ref[...].reshape(tr * W, Cin)
    # TODO(synk): cast dot operands to bf16 (keep f32 accumulation) for ~2x MXU
    # throughput on v6e/v7x; kept f32 here to match PyTorch f32 numerics exactly.
    for kh in range(2):
        y = jnp.dot(x, w_ref[kh], preferred_element_type=jnp.float32) + b_ref[...]
        o_ref[:, kh, :, :] = y.reshape(tr, W, -1).astype(o_ref.dtype)


def conv_transpose_2x2_s2(x_nhwc, w_pt, b, *, row_tile=8):
    """ConvTranspose2d(k=2, s=2).  w_pt: (Cin, Cout, 2, 2) PyTorch layout."""
    N, H, W, Cin = x_nhwc.shape
    Cout = w_pt.shape[1]
    # (Cin, Cout, kh, kw) -> (kh, Cin, kw, Cout) -> (2, Cin, 2*Cout); columns are (kw, co)
    w2 = jnp.transpose(w_pt, (2, 0, 3, 1)).reshape(2, Cin, 2 * Cout)
    b2 = jnp.tile(b, (2,)).reshape(1, 2 * Cout)          # (kw, co) order
    x_rows = x_nhwc.reshape(N * H, W, Cin)               # free reshape
    NH = N * H
    tr = _largest_divisor_at_most(NH, row_tile)          # rows per grid step

    flops = 2 * NH * W * Cin * 4 * Cout
    bytes_acc = 4 * (NH * W * Cin + 2 * Cin * 2 * Cout + 2 * Cout
                     + NH * 2 * W * 2 * Cout)

    y = pl.pallas_call(
        _deconv2x2_kernel,
        out_shape=jax.ShapeDtypeStruct((NH, 2, W, 2 * Cout), x_nhwc.dtype),
        grid=(NH // tr,),
        in_specs=[
            pl.BlockSpec((tr, W, Cin), lambda i: (i, 0, 0)),
            pl.BlockSpec((2, Cin, 2 * Cout), lambda i: (0, 0, 0)),
            pl.BlockSpec((1, 2 * Cout), lambda i: (0, 0)),
        ],
        out_specs=pl.BlockSpec((tr, 2, W, 2 * Cout), lambda i: (i, 0, 0, 0)),
        compiler_params=pltpu.CompilerParams(dimension_semantics=("parallel",)),
        cost_estimate=pl.CostEstimate(flops=flops, transcendentals=0,
                                      bytes_accessed=bytes_acc),
    )(x_rows, w2, b2)
    # (NH, 2, W, 2*Cout) row-major IS (N, 2H, 2W, Cout): interleave is a free reshape.
    return y.reshape(N, 2 * H, 2 * W, Cout)


# ----------------------------------------------------------------------------
# Kernel 2: fused 3x3 conv (padding=1, no bias) + folded BatchNorm + ReLU,
# row-tiled with a 2-row halo fetched by explicit DMA into VMEM scratch.
# Supports 1 or 2 inputs (2-input form fuses the torch.cat of the skip connection).
# ----------------------------------------------------------------------------
def _accum_conv_taps(xbuf_ref, w_ref, acc, th, W):
    """Accumulate the 3x3 taps of one input into acc ((th*W, Cout), f32).

    xbuf_ref: VMEM (1, th+2, W+2, Cin) haloed row window.
    w_ref:    VMEM (3, 3*Cin, Cout), columns ordered (kx, ci) within each ky.
    The 3 kx taps are concatenated along channels so each MXU dot has K = 3*Cin.
    """
    Cin = xbuf_ref.shape[-1]
    x = xbuf_ref[0]                                   # (th+2, W+2, Cin)
    for ky in range(3):
        rows = x[ky:ky + th]                          # (th, W+2, Cin)
        taps = jnp.concatenate(
            [rows[:, 0:W, :], rows[:, 1:W + 1, :], rows[:, 2:W + 2, :]], axis=-1)
        acc = acc + jnp.dot(taps.reshape(th * W, 3 * Cin), w_ref[ky],
                            preferred_element_type=jnp.float32)
    return acc


def _conv3x3_bn_relu_kernel_1(x_hbm, w_ref, b_ref, o_ref, xbuf, sem):
    n = pl.program_id(0)
    h = pl.program_id(1)
    _, th, W, Cout = o_ref.shape
    # TODO(synk): double-buffer this row-window DMA across grid steps to fully
    # overlap the input fetch with compute (the output side is already pipelined).
    cp = pltpu.make_async_copy(
        x_hbm.at[pl.ds(n, 1), pl.ds(h * th, th + 2)], xbuf, sem.at[0])
    cp.start()
    cp.wait()
    acc = jnp.zeros((th * W, Cout), jnp.float32)
    acc = _accum_conv_taps(xbuf, w_ref, acc, th, W)
    y = jnp.maximum(acc + b_ref[...], 0.0)
    o_ref[...] = y.reshape(1, th, W, Cout).astype(o_ref.dtype)


def _conv3x3_bn_relu_kernel_2(xa_hbm, xb_hbm, wa_ref, wb_ref, b_ref, o_ref,
                              abuf, bbuf, sem):
    n = pl.program_id(0)
    h = pl.program_id(1)
    _, th, W, Cout = o_ref.shape
    cpa = pltpu.make_async_copy(
        xa_hbm.at[pl.ds(n, 1), pl.ds(h * th, th + 2)], abuf, sem.at[0])
    cpb = pltpu.make_async_copy(
        xb_hbm.at[pl.ds(n, 1), pl.ds(h * th, th + 2)], bbuf, sem.at[1])
    cpa.start()
    cpb.start()
    cpa.wait()
    cpb.wait()
    acc = jnp.zeros((th * W, Cout), jnp.float32)
    acc = _accum_conv_taps(abuf, wa_ref, acc, th, W)      # x2 channels
    acc = _accum_conv_taps(bbuf, wb_ref, acc, th, W)      # upsampled x1 channels
    y = jnp.maximum(acc + b_ref[...], 0.0)
    o_ref[...] = y.reshape(1, th, W, Cout).astype(o_ref.dtype)


def conv3x3_bn_relu(xs, w_pt, gamma, beta, mean, var, *, row_tile=8, eps=1e-5):
    """3x3 conv (padding=1, bias=False) over the channel-concat of `xs`,
    with BatchNorm (eval-mode, folded) and ReLU fused.

    xs:    list of 1 or 2 NHWC tensors with identical (N, H, W).  The concat is
           fused by splitting the weight per input and accumulating in-kernel.
    w_pt:  (Cout, sum(Ci), 3, 3) PyTorch conv weight.
    """
    assert len(xs) in (1, 2)
    N, H, W = xs[0].shape[:3]
    cs = [int(x.shape[-1]) for x in xs]
    Cout = int(w_pt.shape[0])

    scale, bias = _fold_bn(gamma, beta, mean, var, eps)
    # Fold BN scale into the weights (numerically identical, saves a VPU multiply).
    w_hwio = jnp.transpose(w_pt, (2, 3, 1, 0)) * scale        # (3, 3, Cin_total, Cout)
    ws, off = [], 0
    for c in cs:
        ws.append(w_hwio[:, :, off:off + c, :].reshape(3, 3 * c, Cout))
        off += c
    b2 = bias.reshape(1, Cout).astype(jnp.float32)

    th = _largest_divisor_at_most(H, row_tile)                # output rows per step
    x_pads = [jnp.pad(x, ((0, 0), (1, 1), (1, 1), (0, 0))) for x in xs]

    kernel = _conv3x3_bn_relu_kernel_1 if len(xs) == 1 else _conv3x3_bn_relu_kernel_2
    in_specs = ([pl.BlockSpec(memory_space=pl.ANY)] * len(xs)
                + [pl.BlockSpec((3, 3 * c, Cout), lambda n, h: (0, 0, 0)) for c in cs]
                + [pl.BlockSpec((1, Cout), lambda n, h: (0, 0))])
    scratch = ([pltpu.VMEM((1, th + 2, W + 2, c), x.dtype)
                for c, x in zip(cs, xs)]
               + [pltpu.SemaphoreType.DMA((len(xs),))])

    cin_total = sum(cs)
    flops = 2 * N * H * W * 9 * cin_total * Cout
    bytes_acc = 4 * (N * (H + 2) * (W + 2) * cin_total + 9 * cin_total * Cout
                     + Cout + N * H * W * Cout)

    return pl.pallas_call(
        kernel,
        out_shape=jax.ShapeDtypeStruct((N, H, W, Cout), xs[0].dtype),
        grid=(N, H // th),
        in_specs=in_specs,
        out_specs=pl.BlockSpec((1, th, W, Cout), lambda n, h: (n, h, 0, 0)),
        scratch_shapes=scratch,
        compiler_params=pltpu.CompilerParams(
            dimension_semantics=("parallel", "parallel")),
        cost_estimate=pl.CostEstimate(flops=flops, transcendentals=0,
                                      bytes_accessed=bytes_acc),
    )(*x_pads, *ws, b2)


# ----------------------------------------------------------------------------
# Parameters (deterministic init, PyTorch shapes)
# ----------------------------------------------------------------------------
def init_params(key, in_channels, out_channels):
    half = in_channels // 2   # ConvTranspose output channels == DoubleConv mid channels
    mid = half
    ks = jax.random.split(key, 8)
    p = {
        "up_w": 0.1 * jax.random.normal(ks[0], (in_channels, half, 2, 2), jnp.float32),
        "up_b": 0.1 * jax.random.normal(ks[1], (half,), jnp.float32),
        "conv1_w": 0.1 * jax.random.normal(ks[2], (mid, in_channels, 3, 3), jnp.float32),
        "bn1_gamma": 1.0 + 0.1 * jax.random.normal(ks[3], (mid,), jnp.float32),
        "bn1_beta": 0.1 * jax.random.normal(ks[4], (mid,), jnp.float32),
        "bn1_mean": jnp.zeros((mid,), jnp.float32),
        "bn1_var": jnp.ones((mid,), jnp.float32),
        "conv2_w": 0.1 * jax.random.normal(ks[5], (out_channels, mid, 3, 3), jnp.float32),
        "bn2_gamma": 1.0 + 0.1 * jax.random.normal(ks[6], (out_channels,), jnp.float32),
        "bn2_beta": 0.1 * jax.random.normal(ks[7], (out_channels,), jnp.float32),
        "bn2_mean": jnp.zeros((out_channels,), jnp.float32),
        "bn2_var": jnp.ones((out_channels,), jnp.float32),
    }
    return p


def _fold_bn(gamma, beta, mean, var, eps=1e-5):
    scale = gamma / jnp.sqrt(var + eps)
    bias = beta - mean * scale
    return scale, bias


def _pad_or_crop_hw(x, diffY, diffX):
    """F.pad([dX//2, dX-dX//2, dY//2, dY-dY//2]) semantics, incl. negative (crop) pads."""
    Ht = x.shape[1] + diffY
    Wt = x.shape[2] + diffX
    top, left = diffY // 2, diffX // 2
    x = jnp.pad(x, ((0, 0),
                    (max(top, 0), max(diffY - top, 0)),
                    (max(left, 0), max(diffX - left, 0)),
                    (0, 0)))
    return x[:, max(-top, 0):max(-top, 0) + Ht,
             max(-left, 0):max(-left, 0) + Wt, :]


# ----------------------------------------------------------------------------
# Up.forward
# ----------------------------------------------------------------------------
def up_forward(x1_nchw, x2_nchw, params, *, deconv_row_tile=8, conv_row_tile=8):
    # TODO(synk): BatchNorm is folded with eval-mode running statistics;
    # training-mode batch statistics are not reproduced.
    # NOTE: row_tile defaults are sized for the small demo; for production
    # U-Net shapes use larger tiles (e.g. 32-64 conv rows, ~512-1024 deconv rows).
    x1 = jnp.transpose(x1_nchw, (0, 2, 3, 1))     # NCHW -> NHWC
    x2 = jnp.transpose(x2_nchw, (0, 2, 3, 1))

    # self.up(x1) — 2x2 interleave fused into the kernel's output layout.
    x1u = conv_transpose_2x2_s2(x1, params["up_w"], params["up_b"],
                                row_tile=deconv_row_tile)

    # F.pad to x2's spatial size (a no-op in the usual H2 == 2*H1 case).
    diffY = x2.shape[1] - x1u.shape[1]
    diffX = x2.shape[2] - x1u.shape[2]
    if diffY != 0 or diffX != 0:
        x1u = _pad_or_crop_hw(x1u, diffY, diffX)

    # torch.cat([x2, x1], dim=1) fused into the first conv (weight split per input).
    y = conv3x3_bn_relu([x2, x1u], params["conv1_w"],
                        params["bn1_gamma"], params["bn1_beta"],
                        params["bn1_mean"], params["bn1_var"],
                        row_tile=conv_row_tile)
    y = conv3x3_bn_relu([y], params["conv2_w"],
                        params["bn2_gamma"], params["bn2_beta"],
                        params["bn2_mean"], params["bn2_var"],
                        row_tile=conv_row_tile)
    return jnp.transpose(y, (0, 3, 1, 2))         # back to NCHW


# ----------------------------------------------------------------------------
# Pure-JAX reference (for correctness check)
# ----------------------------------------------------------------------------
def _reference(x1_nchw, x2_nchw, params):
    x1 = jnp.transpose(x1_nchw, (0, 2, 3, 1))
    x2 = jnp.transpose(x2_nchw, (0, 2, 3, 1))
    N, H, W, Cin = x1.shape
    Cout = params["up_w"].shape[1]
    t = jnp.einsum("nhwi,iokl->nhkwlo", x1, params["up_w"])
    y1 = t.reshape(N, 2 * H, 2 * W, Cout) + params["up_b"]
    diffY = x2.shape[1] - y1.shape[1]
    diffX = x2.shape[2] - y1.shape[2]
    y1 = jnp.pad(y1, ((0, 0), (diffY // 2, diffY - diffY // 2),
                      (diffX // 2, diffX - diffX // 2), (0, 0)))
    x = jnp.concatenate([x2, y1], axis=-1)

    def conv_bn_relu(x, w_pt, gamma, beta, mean, var):
        w_hwio = jnp.transpose(w_pt, (2, 3, 1, 0))
        y = lax.conv_general_dilated(
            x, w_hwio, window_strides=(1, 1), padding="SAME",
            dimension_numbers=("NHWC", "HWIO", "NHWC"))
        s, b = _fold_bn(gamma, beta, mean, var)
        return jnp.maximum(y * s + b, 0.0)

    y = conv_bn_relu(x, params["conv1_w"], params["bn1_gamma"], params["bn1_beta"],
                     params["bn1_mean"], params["bn1_var"])
    y = conv_bn_relu(y, params["conv2_w"], params["bn2_gamma"], params["bn2_beta"],
                     params["bn2_mean"], params["bn2_var"])
    return jnp.transpose(y, (0, 3, 1, 2))


if __name__ == "__main__":
    key = jax.random.PRNGKey(0)
    k1, k2, k3 = jax.random.split(key, 3)

    N, in_channels, out_channels = 2, 4, 4
    # x1: low-res feature map (to be upsampled); x2: skip connection at 2x spatial size.
    x1 = jax.random.normal(k1, (N, in_channels, 8, 8), jnp.float32)
    x2 = jax.random.normal(k2, (N, in_channels // 2, 16, 16), jnp.float32)
    params = init_params(k3, in_channels, out_channels)

    out = up_forward(x1, x2, params)
    out = jax.block_until_ready(out)

    assert out.shape == (N, out_channels, 16, 16), out.shape
    ref = _reference(x1, x2, params)
    assert jnp.allclose(out, ref, atol=1e-4, rtol=1e-4), float(jnp.max(jnp.abs(out - ref)))

    print("KERNEL_OK")
</pallas_src>

<mosaic_0001>
module attributes {stable_mosaic.version = 11 : i64} {
  func.func @_deconv2x2_kernel(%arg0: i32, %arg1: memref<8x8x4xf32, #tpu.memory_space<vmem>>, %arg2: memref<2x4x4xf32, #tpu.memory_space<vmem>>, %arg3: memref<1x4xf32, #tpu.memory_space<vmem>>, %arg4: memref<8x2x8x4xf32, #tpu.memory_space<vmem>>) attributes {dimension_semantics = [#tpu.dimension_semantics<parallel>], iteration_bounds = array<i64: 2>, scalar_prefetch = 0 : i64, scratch_operands = 0 : i64, tpu.core_type = #tpu.core_type<tc>, window_params = [{transform_indices = @transform_0, window_bounds = array<i64: 8, 8, 4>}, {pipeline_mode = #tpu.pipeline_mode<synchronous>, transform_indices = @transform_1, window_bounds = array<i64: 2, 4, 4>}, {pipeline_mode = #tpu.pipeline_mode<synchronous>, transform_indices = @transform_2, window_bounds = array<i64: 1, 4>}, {transform_indices = @transform_3, window_bounds = array<i64: 8, 2, 8, 4>}]} {
    %c0 = arith.constant 0 : index
    %c0_0 = arith.constant 0 : index
    %c0_1 = arith.constant 0 : index
    %0 = vector.load %arg1[%c0, %c0_0, %c0_1] : memref<8x8x4xf32, #tpu.memory_space<vmem>>, vector<8x8x4xf32>
    %1 = vector.shape_cast %0 : vector<8x8x4xf32> to vector<64x4xf32>
    %c0_2 = arith.constant 0 : index
    %c0_3 = arith.constant 0 : index
    %c0_4 = arith.constant 0 : index
    %2 = vector.load %arg2[%c0_2, %c0_3, %c0_4] : memref<2x4x4xf32, #tpu.memory_space<vmem>>, vector<1x4x4xf32>
    %3 = vector.shape_cast %2 : vector<1x4x4xf32> to vector<4x4xf32>
    %cst = arith.constant dense<0.000000e+00> : vector<64x4xf32>
    %4 = tpu.matmul %1, %3, %cst {dimension_numbers = #tpu.dot_dimension_numbers<[1], [0], [0], [1], [0, 0, 1, 1], [], []>} : vector<64x4xf32>, vector<4x4xf32>, vector<64x4xf32> -> vector<64x4xf32>
    %c0_5 = arith.constant 0 : index
    %c0_6 = arith.constant 0 : index
    %5 = vector.load %arg3[%c0_5, %c0_6] : memref<1x4xf32, #tpu.memory_space<vmem>>, vector<1x4xf32>
    %6 = vector.broadcast %5 : vector<1x4xf32> to vector<64x4xf32>
    %7 = arith.addf %4, %6 : vector<64x4xf32>
    %8 = vector.shape_cast %7 : vector<64x4xf32> to vector<8x8x4xf32>
    %c0_7 = arith.constant 0 : index
    %c0_8 = arith.constant 0 : index
    %c0_9 = arith.constant 0 : index
    %c0_10 = arith.constant 0 : index
    %9 = vector.load %arg4[%c0_7, %c0_8, %c0_9, %c0_10] : memref<8x2x8x4xf32, #tpu.memory_space<vmem>>, vector<8x1x8x4xf32>
    %10 = vector.shape_cast %9 : vector<8x1x8x4xf32> to vector<8x8x4xf32>
    %11 = vector.shape_cast %8 : vector<8x8x4xf32> to vector<8x1x8x4xf32>
    tpu.vector_store %arg4[%c0_7, %c0_8, %c0_9, %c0_10], %11 {strides = array<i32>} : memref<8x2x8x4xf32, #tpu.memory_space<vmem>>, vector<8x1x8x4xf32>,
    %c1 = arith.constant 1 : index
    %c0_11 = arith.constant 0 : index
    %c0_12 = arith.constant 0 : index
    %12 = vector.load %arg2[%c1, %c0_11, %c0_12] : memref<2x4x4xf32, #tpu.memory_space<vmem>>, vector<1x4x4xf32>
    %13 = vector.shape_cast %12 : vector<1x4x4xf32> to vector<4x4xf32>
    %cst_13 = arith.constant dense<0.000000e+00> : vector<64x4xf32>
    %14 = tpu.matmul %1, %13, %cst_13 {dimension_numbers = #tpu.dot_dimension_numbers<[1], [0], [0], [1], [0, 0, 1, 1], [], []>} : vector<64x4xf32>, vector<4x4xf32>, vector<64x4xf32> -> vector<64x4xf32>
    %c0_14 = arith.constant 0 : index
    %c0_15 = arith.constant 0 : index
    %15 = vector.load %arg3[%c0_14, %c0_15] : memref<1x4xf32, #tpu.memory_space<vmem>>, vector<1x4xf32>
    %16 = vector.broadcast %15 : vector<1x4xf32> to vector<64x4xf32>
    %17 = arith.addf %14, %16 : vector<64x4xf32>
    %18 = vector.shape_cast %17 : vector<64x4xf32> to vector<8x8x4xf32>
    %c0_16 = arith.constant 0 : index
    %c1_17 = arith.constant 1 : index
    %c0_18 = arith.constant 0 : index
    %c0_19 = arith.constant 0 : index
    %19 = vector.load %arg4[%c0_16, %c1_17, %c0_18, %c0_19] : memref<8x2x8x4xf32, #tpu.memory_space<vmem>>, vector<8x1x8x4xf32>
    %20 = vector.shape_cast %19 : vector<8x1x8x4xf32> to vector<8x8x4xf32>
    %21 = vector.shape_cast %18 : vector<8x8x4xf32> to vector<8x1x8x4xf32>
    tpu.vector_store %arg4[%c0_16, %c1_17, %c0_18, %c0_19], %21 {strides = array<i32>} : memref<8x2x8x4xf32, #tpu.memory_space<vmem>>, vector<8x1x8x4xf32>,
    return
  }
  func.func @transform_0(%arg0: i32) -> (i32, i32, i32) {
    %c0_i32 = arith.constant 0 : i32
    %c0_i32_0 = arith.constant 0 : i32
    %c0_i32_1 = arith.constant 0 : i32
    return %arg0, %c0_i32, %c0_i32_0 : i32, i32, i32
  }
  func.func @transform_1(%arg0: i32) -> (i32, i32, i32) {
    %c0_i32 = arith.constant 0 : i32
    %c0_i32_0 = arith.constant 0 : i32
    %c0_i32_1 = arith.constant 0 : i32
    %c0_i32_2 = arith.constant 0 : i32
    return %c0_i32, %c0_i32_0, %c0_i32_1 : i32, i32, i32
  }
  func.func @transform_2(%arg0: i32) -> (i32, i32) {
    %c0_i32 = arith.constant 0 : i32
    %c0_i32_0 = arith.constant 0 : i32
    %c0_i32_1 = arith.constant 0 : i32
    return %c0_i32, %c0_i32_0 : i32, i32
  }
  func.func @transform_3(%arg0: i32) -> (i32, i32, i32, i32) {
    %c0_i32 = arith.constant 0 : i32
    %c0_i32_0 = arith.constant 0 : i32
    %c0_i32_1 = arith.constant 0 : i32
    %c0_i32_2 = arith.constant 0 : i32
    return %arg0, %c0_i32, %c0_i32_0, %c0_i32_1 : i32, i32, i32, i32
  }
}

</mosaic_0001>

<bundles_post_ra>
// kernel: tpu_custom_call.1
= control target key start
LH: loop header
LB: loop body
LE: loop exit
PB: predicated region body
PF: predicated region fallthrough
CT: control target
= control target key end

     0   :  { %s642_s12 = smov 0   ;;  %s722_s0 = inlined_call_operand.vmem [shape: f32[16,8,4], index: 0, kind: input, shape index: {}]   ;;  %s723_s1 = inlined_call_operand.vmem [shape: f32[2,4,4], index: 1, kind: input, shape index: {}]   ;;  %s724_s2 = inlined_call_operand.vmem [shape: f32[1,4], index: 2, kind: input, shape index: {}]   ;;  %s725_s3 = inlined_call_operand.vmem [shape: f32[16,2,8,4], index: 3, kind: output, shape index: {}]  }
   0x1 LB: > { %s518_s13 = sadd.s32 4294967295, %s620_s12   ;;  %p522_p0 = scmp.ge.s32.totalorder %s620_s12, 1  ;;  %s620_s12 = sphi %s642_s12, %s13_s12  }
   0x2   : > { %p138_p1 = scmp.lt.s32.totalorder %s620_s12, 3 }
   0x4   : > { %p139_p2 = pnand %p522_p0, %p138_p1 }
   0x5   : > { %v184_v0 = vld [vmem:[%s723_s1] sm:$0xf] (!%p139_p2)  ;;  %vm217_vm0 = vcmask (!%p139_p2), 1043456   ;;  %v538_v1 = vld [vmem:[%s723_s1 + $0x4] sm:$0xf] (!%p139_p2)  ;;  %s523_s18 = sshll.u32 (!%p139_p2), %s518_s13, 3 }
   0x6   : > { %142 = sbr.rel (%p139_p2) target bundleno = 246 (0xf6), region = 32  ;;  %578 = vmatprep.subr.msk.mxu0 (!%p139_p2), %vm217_vm0, %v184_v0  ;;  %592 = vmatprep.subr.msk.mxu1 (!%p139_p2), %vm217_vm0, %v538_v1  ;;  %p164_p3 = scmp.lt.s32.totalorder (!%p139_p2), %s523_s18, 15  ;;  %vm192_vm1 = vcmask (!%p139_p2), 31744   ;;  %v528_v10 = vld [vmem:[%s724_s2] ss:$0 sm:$0xff] (!%p139_p2) }
   0x7   : > { %579 = vmatpush3.msk.msra.mxu0 (!%p139_p2), %vm217_vm0, %v184_v0  ;;  %593 = vmatpush3.msk.msra.mxu1 (!%p139_p2), %vm217_vm0, %v538_v1 }
   0xd   : > { %s727_s18 = smov (!%p164_p3, %s523_s18), 15 }
   0xe   : > { %s524_s19 = sshll.u32 %s727_s18, 3  ;;  %s559_s23 = sshll.u32 %s727_s18, 4 }
   0xf   : > { %s167_s22 = scalar_lea.vmem %s722_s0, %s524_s19  ;;  %s685_s28 = scalar_lea.vmem %s725_s3, %s559_s23 }
  0x10   : > { %v176_v2 = vld [vmem:[%s167_s22] sm:$0xff]  ;;  %v177_v3 = vld [vmem:[%s167_s22 + $0x8] sm:$0xff]  ;;  %v178_v4 = vld [vmem:[%s167_s22 + $0x10] sm:$0xff] }
  0x11   : > { %580 = vmatprep.mubr.msk.f32.mxu0 %vm192_vm1, %v176_v2  ;;  %594 = vmatprep.mubr.msk.f32.mxu1 %vm192_vm1, %v176_v2  ;;  %v179_v5 = vld [vmem:[%s167_s22 + $0x18] sm:$0xff]  ;;  %v180_v6 = vld [vmem:[%s167_s22 + $0x20] sm:$0xff]  ;;  %v181_v7 = vld [vmem:[%s167_s22 + $0x28] sm:$0xff] }
  0x12   : > { %581 = vmatmul.mubr.msk.f32.vlgmr.msra.gmra.mrb[0].mxu0 %vm192_vm1, %v177_v3  ;;  %595 = vmatmul.mubr.msk.f32.vlgmr.msra.gmra.mrb[0].mxu1 %vm192_vm1, %v177_v3  ;;  %v182_v8 = vld [vmem:[%s167_s22 + $0x30] sm:$0xff]  ;;  %v183_v9 = vld [vmem:[%s167_s22 + $0x38] sm:$0xff] }
  0x13   : > { %583 = vmatprep.mubr.msk.f32.mxu0 %vm192_vm1, %v178_v4  ;;  %597 = vmatprep.mubr.msk.f32.mxu1 %vm192_vm1, %v178_v4 }
  0x16   : > { %584 = vmatmul.mubr.msk.f32.gmra.mrb[2].mxu0 %vm192_vm1, %v179_v5  ;;  %598 = vmatmul.mubr.msk.f32.gmra.mrb[2].mxu1 %vm192_vm1, %v179_v5 }
  0x17   : > { %586 = vmatprep.mubr.msk.f32.mxu0 %vm192_vm1, %v180_v6  ;;  %600 = vmatprep.mubr.msk.f32.mxu1 %vm192_vm1, %v180_v6 }
  0x1a   : > { %587 = vmatmul.mubr.msk.f32.gmra.mrb[4].mxu0 %vm192_vm1, %v181_v7  ;;  %601 = vmatmul.mubr.msk.f32.gmra.mrb[4].mxu1 %vm192_vm1, %v181_v7 }
  0x1b   : > { %589 = vmatprep.mubr.msk.f32.mxu0 %vm192_vm1, %v182_v8  ;;  %603 = vmatprep.mubr.msk.f32.mxu1 %vm192_vm1, %v182_v8 }
  0x1e   : > { %590 = vmatmul.mubr.msk.f32.gmra.mrb[6].mxu0 %vm192_vm1, %v183_v9  ;;  %604 = vmatmul.mubr.msk.f32.gmra.mrb[6].mxu1 %vm192_vm1, %v183_v9 }
  0xe5   : > { %v582_v11 = vpop.f32.mrb[0].mxu0  ;;  %v596_v12 = vpop.f32.mrb[0].mxu1 }
  0xe6   : > { %v293_v13 = vadd.f32 %v582_v11, %v528_v10  ;;  %v418_v14 = vadd.f32 %v596_v12, %v528_v10  ;;  %v287_v15 = vpop.f32.mrb[1].mxu0  ;;  %v412_v16 = vpop.f32.mrb[1].mxu1 }
  0xe7   : > { %v288_v17 = vadd.f32 %v528_v10, %v287_v15  ;;  %v413_v18 = vadd.f32 %v528_v10, %v412_v16 }
  0xe8   : > { %327 = vst.msk [vmem:[%s685_s28 + $0x10] sm:$0xff] %vm192_vm1, %v293_v13  ;;  %550 = vst.msk [vmem:[%s685_s28 + $0x18] sm:$0xff] %vm192_vm1, %v418_v14 }
  0xe9   : > { %326 = vst.msk [vmem:[%s685_s28] sm:$0xff] %vm192_vm1, %v288_v17  ;;  %549 = vst.msk [vmem:[%s685_s28 + $0x8] sm:$0xff] %vm192_vm1, %v413_v18  ;;  %v585_v19 = vpop.f32.mrb[2].mxu0  ;;  %v599_v20 = vpop.f32.mrb[2].mxu1 }
  0xea   : > { %v303_v21 = vadd.f32 %v585_v19, %v528_v10  ;;  %v428_v22 = vadd.f32 %v599_v20, %v528_v10  ;;  %v297_v23 = vpop.f32.mrb[3].mxu0  ;;  %v422_v24 = vpop.f32.mrb[3].mxu1 }
  0xeb   : > { %v298_v25 = vadd.f32 %v528_v10, %v297_v23  ;;  %v423_v26 = vadd.f32 %v528_v10, %v422_v24 }
  0xec   : > { %329 = vst.msk [vmem:[%s685_s28 + $0x30] sm:$0xff] %vm192_vm1, %v303_v21  ;;  %552 = vst.msk [vmem:[%s685_s28 + $0x38] sm:$0xff] %vm192_vm1, %v428_v22 }
  0xed   : > { %328 = vst.msk [vmem:[%s685_s28 + $0x20] sm:$0xff] %vm192_vm1, %v298_v25  ;;  %551 = vst.msk [vmem:[%s685_s28 + $0x28] sm:$0xff] %vm192_vm1, %v423_v26  ;;  %v588_v27 = vpop.f32.mrb[4].mxu0  ;;  %v602_v28 = vpop.f32.mrb[4].mxu1 }
  0xee   : > { %v313_v29 = vadd.f32 %v588_v27, %v528_v10  ;;  %v438_v30 = vadd.f32 %v602_v28, %v528_v10  ;;  %v307_v31 = vpop.f32.mrb[5].mxu0  ;;  %v432_v32 = vpop.f32.mrb[5].mxu1 }
  0xef   : > { %v308_v33 = vadd.f32 %v528_v10, %v307_v31  ;;  %v433_v34 = vadd.f32 %v528_v10, %v432_v32 }
  0xf0   : > { %331 = vst.msk [vmem:[%s685_s28 + $0x50] sm:$0xff] %vm192_vm1, %v313_v29  ;;  %554 = vst.msk [vmem:[%s685_s28 + $0x58] sm:$0xff] %vm192_vm1, %v438_v30 }
  0xf1   : > { %330 = vst.msk [vmem:[%s685_s28 + $0x40] sm:$0xff] %vm192_vm1, %v308_v33  ;;  %553 = vst.msk [vmem:[%s685_s28 + $0x48] sm:$0xff] %vm192_vm1, %v433_v34  ;;  %v591_v35 = vpop.f32.mrb[6].mxu0  ;;  %v605_v36 = vpop.f32.mrb[6].mxu1 }
  0xf2   : > { %v323_v37 = vadd.f32 %v591_v35, %v528_v10  ;;  %v448_v38 = vadd.f32 %v605_v36, %v528_v10  ;;  %v317_v39 = vpop.f32.mrb[7].mxu0  ;;  %v442_v40 = vpop.f32.mrb[7].mxu1 }
  0xf3   : > { %v318_v41 = vadd.f32 %v528_v10, %v317_v39  ;;  %v443_v42 = vadd.f32 %v528_v10, %v442_v40 }
  0xf4   : > { %333 = vst.msk [vmem:[%s685_s28 + $0x70] sm:$0xff] %vm192_vm1, %v323_v37  ;;  %556 = vst.msk [vmem:[%s685_s28 + $0x78] sm:$0xff] %vm192_vm1, %v448_v38 }
  0xf5   : > { %332 = vst.msk [vmem:[%s685_s28 + $0x60] sm:$0xff] %vm192_vm1, %v318_v41  ;;  %555 = vst.msk [vmem:[%s685_s28 + $0x68] sm:$0xff] %vm192_vm1, %v443_v42 }
  0xf6 PF: > { %s13_s12 = sadd.s32 1, %s620_s12  }
  0xf7   : > { %p10_p4 = scmp.ge.s32.totalorder %s13_s12, 4  }
  0xf9   :  { %12 = sbr.rel (!%p10_p4) target bundleno = 1 (0x1), region = 64 }

</bundles_post_ra>
